<compile_context>
chip_gen: v5e
topology: v5e:2x2
jax: 0.10.0
libtpu: 0.0.40
codegen_flags: <defaults>
</compile_context>

<pallas_src>
import jax
import jax.numpy as jnp
from jax.experimental import pallas as pl
from jax.experimental.pallas import tpu as pltpu


def _round_up(x, m):
    return ((x + m - 1) // m) * m


def mlp2_kernel(data_ref, wE_ref, wF_ref, bEF_ref,
                w1_ref, b1_ref, w2_ref, b2_ref, out_ref):
    data = data_ref[...]                                   # (TB, 2) f32
    E = data[:, 0:1]                                       # (TB, 1)
    F = data[:, 1:2]                                       # (TB, 1)

    # Fused fc_E1 / fc_F1 (Linear(1,64) each) + ReLU as one lane-dense
    # (TB,128) VPU expression.  wE_ref has wE in lanes [0:64] and zeros in
    # [64:128]; wF_ref is the complement; bEF_ref = [bE | bF].  The zero
    # padding makes the cross terms vanish, so this equals
    # cat([relu? no - relu applied after], ...) == [E*wE+bE | F*wF+bF].
    x_all = jnp.maximum(E * wE_ref[...] + F * wF_ref[...] + bEF_ref[...], 0.0)

    mxu_dtype = w1_ref.dtype                               # bf16 (fast) or f32 (exact)

    # fc1: single K=128 MXU matmul on the fused activation (replaces the
    # previous two K=64 matmuls on value-level slices of w1).
    h = jnp.dot(x_all.astype(mxu_dtype), w1_ref[...],
                preferred_element_type=jnp.float32)
    h = jnp.maximum(h + b1_ref[...], 0.0)                  # (TB, 64) f32

    # fc2: output columns are zero-padded to a multiple of 128 → lane-dense store.
    out = jnp.dot(h.astype(mxu_dtype), w2_ref[...],
                  preferred_element_type=jnp.float32) + b2_ref[...]
    out_ref[...] = out.astype(out_ref.dtype)               # (TB, out_pad)


def _prepare_params(params, out_pad, mxu_dtype):
    """Pack/pad weights for the fused, lane-dense kernel layout."""
    wE = params["wE"].reshape(1, 64).astype(jnp.float32)
    wF = params["wF"].reshape(1, 64).astype(jnp.float32)
    z64 = jnp.zeros((1, 64), jnp.float32)
    wE128 = jnp.concatenate([wE, z64], axis=1)                      # (1,128) VPU, f32
    wF128 = jnp.concatenate([z64, wF], axis=1)                      # (1,128) VPU, f32
    bEF = jnp.concatenate([params["bE"], params["bF"]], axis=1)     # (1,128) f32
    bEF = bEF.astype(jnp.float32)

    w1 = params["w1"].astype(mxu_dtype)                             # (128,64) MXU operand
    b1 = params["b1"].astype(jnp.float32)                           # (1,64)   f32 add

    out_dim = params["w2"].shape[1]
    w2p = jnp.zeros((64, out_pad), mxu_dtype).at[:, :out_dim].set(
        params["w2"].astype(mxu_dtype))                             # (64,out_pad)
    b2p = jnp.zeros((1, out_pad), jnp.float32).at[:, :out_dim].set(
        params["b2"].astype(jnp.float32))                           # (1,out_pad)
    return wE128, wF128, bEF, w1, b1, w2p, b2p


def mlp_model2_forward(data, params, *, mxu_dtype=jnp.bfloat16, tb_max=1024):
    B = data.shape[0]
    out_dim = params["w2"].shape[1]
    out_pad = _round_up(out_dim, 128)

    # Tile size: biggest batch tile up to tb_max (sized for v7x's VMEM with the
    # lane-padded (TB,128) in/out blocks double-buffered), rounded to sublanes.
    TB = min(tb_max, _round_up(B, 8))
    grid = (pl.cdiv(B, TB),)

    wE128, wF128, bEF, w1, b1, w2p, b2p = _prepare_params(params, out_pad, mxu_dtype)

    def const_spec(shape):
        # Weights/biases: same block every grid step → loaded once, VMEM-resident.
        return pl.BlockSpec(shape, lambda i: (0, 0))

    in_specs = [
        pl.BlockSpec((TB, 2), lambda i: (i, 0)),        # data tile walks the batch
        const_spec((1, 128)),                            # wE128
        const_spec((1, 128)),                            # wF128
        const_spec((1, 128)),                            # bEF
        const_spec((128, 64)),                           # w1
        const_spec((1, 64)),                             # b1
        const_spec((64, out_pad)),                       # w2 (padded)
        const_spec((1, out_pad)),                        # b2 (padded)
    ]
    out_specs = pl.BlockSpec((TB, out_pad), lambda i: (i, 0))

    weight_bytes = sum(int(a.size) * a.dtype.itemsize
                       for a in (wE128, wF128, bEF, w1, b1, w2p, b2p))
    cost = pl.CostEstimate(
        flops=2 * B * (128 * 64 + 64 * out_pad) + 6 * B * 128,
        transcendentals=0,
        bytes_accessed=B * (2 + out_pad) * 4 + weight_bytes,
    )

    out_padded = pl.pallas_call(
        mlp2_kernel,
        out_shape=jax.ShapeDtypeStruct((B, out_pad), jnp.float32),
        grid=grid,
        in_specs=in_specs,
        out_specs=out_specs,
        compiler_params=pltpu.CompilerParams(
            dimension_semantics=("parallel",),           # megacore sharding on v7x
            vmem_limit_bytes=32 * 1024 * 1024,           # safe ceiling on v5e/v6e/v7x
        ),
        cost_estimate=cost,
    )(data, wE128, wF128, bEF, w1, b1, w2p, b2p)

    return out_padded[:, :out_dim]


def init_params(key, output_dim):
    """Deterministic init mimicking nn.Linear's U(-1/sqrt(fan_in), 1/sqrt(fan_in))."""
    def linear(key, fan_in, fan_out):
        kw, kb = jax.random.split(key)
        bound = 1.0 / jnp.sqrt(float(fan_in))
        w = jax.random.uniform(kw, (fan_in, fan_out), jnp.float32, -bound, bound)
        b = jax.random.uniform(kb, (1, fan_out), jnp.float32, -bound, bound)
        return w, b

    kE, kF, k1, k2 = jax.random.split(key, 4)
    wE, bE = linear(kE, 1, 64)
    wF, bF = linear(kF, 1, 64)
    w1, b1 = linear(k1, 128, 64)
    w2, b2 = linear(k2, 64, output_dim)
    return {"wE": wE, "bE": bE, "wF": wF, "bF": bF,
            "w1": w1, "b1": b1, "w2": w2, "b2": b2}


def reference_forward(data, params):
    """Plain-JAX reference with identical semantics (for correctness check)."""
    E = data[:, 0:1]
    F = data[:, 1:2]
    x_E1 = jax.nn.relu(E @ params["wE"] + params["bE"])
    x_F1 = jax.nn.relu(F @ params["wF"] + params["bF"])
    x_all = jnp.concatenate([x_E1, x_F1], axis=1)
    h = jax.nn.relu(x_all @ params["w1"] + params["b1"])
    return h @ params["w2"] + params["b2"]


if __name__ == "__main__":
    key = jax.random.PRNGKey(0)
    k_params, k_data = jax.random.split(key)

    B = 8
    output_dim = 8
    params = init_params(k_params, output_dim)
    data = jax.random.normal(k_data, (B, 2), jnp.float32)

    ref = reference_forward(data, params)

    # Exact path (f32 MXU operands): bit-parity-class check against the reference.
    out_f32 = jax.block_until_ready(
        mlp_model2_forward(data, params, mxu_dtype=jnp.float32))
    assert out_f32.shape == (B, output_dim)
    assert jnp.allclose(out_f32, ref, atol=1e-5, rtol=1e-5)

    # Fast path (bf16 MXU operands, f32 accumulation): default for v6e/v7x peak
    # MXU rate; tolerance loosened accordingly.
    out_bf16 = jax.block_until_ready(
        mlp_model2_forward(data, params, mxu_dtype=jnp.bfloat16))
    assert out_bf16.shape == (B, output_dim)
    assert jnp.allclose(out_bf16, ref, atol=5e-2, rtol=5e-2)

    print("KERNEL_OK")
</pallas_src>

<mosaic_0001>
module attributes {stable_mosaic.version = 11 : i64} {
  func.func @mlp2_kernel(%arg0: i32, %arg1: memref<8x2xf32, #tpu.memory_space<vmem>>, %arg2: memref<1x128xf32, #tpu.memory_space<vmem>>, %arg3: memref<1x128xf32, #tpu.memory_space<vmem>>, %arg4: memref<1x128xf32, #tpu.memory_space<vmem>>, %arg5: memref<128x64xf32, #tpu.memory_space<vmem>>, %arg6: memref<1x64xf32, #tpu.memory_space<vmem>>, %arg7: memref<64x128xf32, #tpu.memory_space<vmem>>, %arg8: memref<1x128xf32, #tpu.memory_space<vmem>>, %arg9: memref<8x128xf32, #tpu.memory_space<vmem>>) attributes {dimension_semantics = [#tpu.dimension_semantics<parallel>], iteration_bounds = array<i64: 1>, scalar_prefetch = 0 : i64, scratch_operands = 0 : i64, tpu.core_type = #tpu.core_type<tc>, window_params = [{transform_indices = @transform_0, window_bounds = array<i64: 8, 2>}, {pipeline_mode = #tpu.pipeline_mode<synchronous>, transform_indices = @transform_1, window_bounds = array<i64: 1, 128>}, {pipeline_mode = #tpu.pipeline_mode<synchronous>, transform_indices = @transform_2, window_bounds = array<i64: 1, 128>}, {pipeline_mode = #tpu.pipeline_mode<synchronous>, transform_indices = @transform_3, window_bounds = array<i64: 1, 128>}, {pipeline_mode = #tpu.pipeline_mode<synchronous>, transform_indices = @transform_4, window_bounds = array<i64: 128, 64>}, {pipeline_mode = #tpu.pipeline_mode<synchronous>, transform_indices = @transform_5, window_bounds = array<i64: 1, 64>}, {pipeline_mode = #tpu.pipeline_mode<synchronous>, transform_indices = @transform_6, window_bounds = array<i64: 64, 128>}, {pipeline_mode = #tpu.pipeline_mode<synchronous>, transform_indices = @transform_7, window_bounds = array<i64: 1, 128>}, {transform_indices = @transform_8, window_bounds = array<i64: 8, 128>}]} {
    %c0 = arith.constant 0 : index
    %c0_0 = arith.constant 0 : index
    %0 = vector.load %arg1[%c0, %c0_0] : memref<8x2xf32, #tpu.memory_space<vmem>>, vector<8x2xf32>
    %1 = vector.extract_strided_slice %0 {offsets = [0, 0], sizes = [8, 1], strides = [1, 1]} : vector<8x2xf32> to vector<8x1xf32>
    %2 = vector.extract_strided_slice %0 {offsets = [0, 1], sizes = [8, 1], strides = [1, 1]} : vector<8x2xf32> to vector<8x1xf32>
    %c0_1 = arith.constant 0 : index
    %c0_2 = arith.constant 0 : index
    %3 = vector.load %arg2[%c0_1, %c0_2] : memref<1x128xf32, #tpu.memory_space<vmem>>, vector<1x128xf32>
    %4 = vector.broadcast %1 : vector<8x1xf32> to vector<8x128xf32>
    %5 = vector.broadcast %3 : vector<1x128xf32> to vector<8x128xf32>
    %6 = arith.mulf %4, %5 : vector<8x128xf32>
    %c0_3 = arith.constant 0 : index
    %c0_4 = arith.constant 0 : index
    %7 = vector.load %arg3[%c0_3, %c0_4] : memref<1x128xf32, #tpu.memory_space<vmem>>, vector<1x128xf32>
    %8 = vector.broadcast %2 : vector<8x1xf32> to vector<8x128xf32>
    %9 = vector.broadcast %7 : vector<1x128xf32> to vector<8x128xf32>
    %10 = arith.mulf %8, %9 : vector<8x128xf32>
    %11 = arith.addf %6, %10 : vector<8x128xf32>
    %c0_5 = arith.constant 0 : index
    %c0_6 = arith.constant 0 : index
    %12 = vector.load %arg4[%c0_5, %c0_6] : memref<1x128xf32, #tpu.memory_space<vmem>>, vector<1x128xf32>
    %13 = vector.broadcast %12 : vector<1x128xf32> to vector<8x128xf32>
    %14 = arith.addf %11, %13 : vector<8x128xf32>
    %cst = arith.constant 0.000000e+00 : f32
    %15 = vector.broadcast %cst : f32 to vector<8x128xf32>
    %16 = arith.maximumf %14, %15 : vector<8x128xf32>
    %c0_7 = arith.constant 0 : index
    %c0_8 = arith.constant 0 : index
    %17 = vector.load %arg5[%c0_7, %c0_8] : memref<128x64xf32, #tpu.memory_space<vmem>>, vector<128x64xf32>
    %cst_9 = arith.constant dense<0.000000e+00> : vector<8x64xf32>
    %18 = tpu.matmul %16, %17, %cst_9 {dimension_numbers = #tpu.dot_dimension_numbers<[1], [0], [0], [1], [0, 0, 1, 1], [], []>} : vector<8x128xf32>, vector<128x64xf32>, vector<8x64xf32> -> vector<8x64xf32>
    %c0_10 = arith.constant 0 : index
    %c0_11 = arith.constant 0 : index
    %19 = vector.load %arg6[%c0_10, %c0_11] : memref<1x64xf32, #tpu.memory_space<vmem>>, vector<1x64xf32>
    %20 = vector.broadcast %19 : vector<1x64xf32> to vector<8x64xf32>
    %21 = arith.addf %18, %20 : vector<8x64xf32>
    %cst_12 = arith.constant 0.000000e+00 : f32
    %22 = vector.broadcast %cst_12 : f32 to vector<8x64xf32>
    %23 = arith.maximumf %21, %22 : vector<8x64xf32>
    %c0_13 = arith.constant 0 : index
    %c0_14 = arith.constant 0 : index
    %24 = vector.load %arg7[%c0_13, %c0_14] : memref<64x128xf32, #tpu.memory_space<vmem>>, vector<64x128xf32>
    %cst_15 = arith.constant dense<0.000000e+00> : vector<8x128xf32>
    %25 = tpu.matmul %23, %24, %cst_15 {dimension_numbers = #tpu.dot_dimension_numbers<[1], [0], [0], [1], [0, 0, 1, 1], [], []>} : vector<8x64xf32>, vector<64x128xf32>, vector<8x128xf32> -> vector<8x128xf32>
    %c0_16 = arith.constant 0 : index
    %c0_17 = arith.constant 0 : index
    %26 = vector.load %arg8[%c0_16, %c0_17] : memref<1x128xf32, #tpu.memory_space<vmem>>, vector<1x128xf32>
    %27 = vector.broadcast %26 : vector<1x128xf32> to vector<8x128xf32>
    %28 = arith.addf %25, %27 : vector<8x128xf32>
    %c0_18 = arith.constant 0 : index
    %c0_19 = arith.constant 0 : index
    %29 = vector.load %arg9[%c0_18, %c0_19] : memref<8x128xf32, #tpu.memory_space<vmem>>, vector<8x128xf32>
    tpu.vector_store %arg9[%c0_18, %c0_19], %28 {strides = array<i32>} : memref<8x128xf32, #tpu.memory_space<vmem>>, vector<8x128xf32>,
    return
  }
  func.func @transform_0(%arg0: i32) -> (i32, i32) {
    %c0_i32 = arith.constant 0 : i32
    %c0_i32_0 = arith.constant 0 : i32
    return %arg0, %c0_i32 : i32, i32
  }
  func.func @transform_1(%arg0: i32) -> (i32, i32) {
    %c0_i32 = arith.constant 0 : i32
    %c0_i32_0 = arith.constant 0 : i32
    %c0_i32_1 = arith.constant 0 : i32
    return %c0_i32, %c0_i32_0 : i32, i32
  }
  func.func @transform_2(%arg0: i32) -> (i32, i32) {
    %c0_i32 = arith.constant 0 : i32
    %c0_i32_0 = arith.constant 0 : i32
    %c0_i32_1 = arith.constant 0 : i32
    return %c0_i32, %c0_i32_0 : i32, i32
  }
  func.func @transform_3(%arg0: i32) -> (i32, i32) {
    %c0_i32 = arith.constant 0 : i32
    %c0_i32_0 = arith.constant 0 : i32
    %c0_i32_1 = arith.constant 0 : i32
    return %c0_i32, %c0_i32_0 : i32, i32
  }
  func.func @transform_4(%arg0: i32) -> (i32, i32) {
    %c0_i32 = arith.constant 0 : i32
    %c0_i32_0 = arith.constant 0 : i32
    %c0_i32_1 = arith.constant 0 : i32
    return %c0_i32, %c0_i32_0 : i32, i32
  }
  func.func @transform_5(%arg0: i32) -> (i32, i32) {
    %c0_i32 = arith.constant 0 : i32
    %c0_i32_0 = arith.constant 0 : i32
    %c0_i32_1 = arith.constant 0 : i32
    return %c0_i32, %c0_i32_0 : i32, i32
  }
  func.func @transform_6(%arg0: i32) -> (i32, i32) {
    %c0_i32 = arith.constant 0 : i32
    %c0_i32_0 = arith.constant 0 : i32
    %c0_i32_1 = arith.constant 0 : i32
    return %c0_i32, %c0_i32_0 : i32, i32
  }
  func.func @transform_7(%arg0: i32) -> (i32, i32) {
    %c0_i32 = arith.constant 0 : i32
    %c0_i32_0 = arith.constant 0 : i32
    %c0_i32_1 = arith.constant 0 : i32
    return %c0_i32, %c0_i32_0 : i32, i32
  }
  func.func @transform_8(%arg0: i32) -> (i32, i32) {
    %c0_i32 = arith.constant 0 : i32
    %c0_i32_0 = arith.constant 0 : i32
    return %arg0, %c0_i32 : i32, i32
  }
}

</mosaic_0001>

<bundles_post_ra>
// kernel: tpu_custom_call.1
= control target key start
LH: loop header
LB: loop body
LE: loop exit
PB: predicated region body
PF: predicated region fallthrough
CT: control target
= control target key end

     0   :  { %v188_v3 = vmov 0   ;;  %s329_s0 = inlined_call_operand.vmem [shape: f32[8,2], index: 0, kind: input, shape index: {}]   ;;  %s330_s1 = inlined_call_operand.vmem [shape: f32[1,128], index: 1, kind: input, shape index: {}]   ;;  %s331_s2 = inlined_call_operand.vmem [shape: f32[1,128], index: 2, kind: input, shape index: {}]   ;;  %s332_s3 = inlined_call_operand.vmem [shape: f32[1,128], index: 3, kind: input, shape index: {}]   ;;  %s333_s4 = inlined_call_operand.vmem [shape: f32[128,64], index: 4, kind: input, shape index: {}]   ;;  %s334_s5 = inlined_call_operand.vmem [shape: f32[1,64], index: 5, kind: input, shape index: {}]   ;;  %s335_s6 = inlined_call_operand.vmem [shape: f32[64,128], index: 6, kind: input, shape index: {}]   ;;  %s336_s7 = inlined_call_operand.vmem [shape: f32[1,128], index: 7, kind: input, shape index: {}]   ;;  %s337_s8 = inlined_call_operand.hbm [shape: f32[8,128], index: 8, kind: output, shape index: {}]  }
   0x1   :  { %v30_v0 = vld [vmem:[%s329_s0] sm:$0xff]  ;;  %v72_v1 = vld [vmem:[%s333_s4 + $0x78] sm:$0xff]  ;;  %v71_v2 = vld [vmem:[%s333_s4 + $0x70] sm:$0xff]  ;;  %155 = vset.pattern.permute.xlu0 %v188_v3 }
   0x2   :  { %77 = vmatpush.msra.mxu0 %v72_v1  ;;  %34 = vperm.xlu0 %155, %v30_v0   ;;  %v70_v4 = vld [vmem:[%s333_s4 + $0x68] sm:$0xff]  ;;  %v69_v5 = vld [vmem:[%s333_s4 + $0x60] sm:$0xff] }
   0x4   :  { %78 = vmatpush.msra.mxu0 %v71_v2 }
   0x5   :  { %13 = vsyncpa [#allocation3], 0  ;;  %v68_v6 = vld [vmem:[%s333_s4 + $0x58] sm:$0xff]  ;;  %v67_v7 = vld [vmem:[%s333_s4 + $0x50] sm:$0xff]  ;;  %v189_v8 = vmov 1   ;;  %vm110_vm0 = vcmask 523264  }
   0x6   :  { %79 = vmatpush.msra.mxu0 %v70_v4  ;;  %v66_v9 = vld [vmem:[%s333_s4 + $0x48] sm:$0xff]  ;;  %v65_v10 = vld [vmem:[%s333_s4 + $0x40] sm:$0xff]  ;;  %v64_v11 = vld [vmem:[%s333_s4 + $0x38] sm:$0xff]  ;;  %s190_s0 = smov [#allocation2]  }
   0x7   :  { %v63_v12 = vld [vmem:[%s333_s4 + $0x30] sm:$0xff]  ;;  %v62_v13 = vld [vmem:[%s333_s4 + $0x28] sm:$0xff]  ;;  %v61_v14 = vld [vmem:[%s333_s4 + $0x20] sm:$0xff]  ;;  %s140_s15 = sshll.u32 %s190_s0, 4  ;;  %s141_s15 = int_to_ptr.vmem [resolvable:$true] %s140_s15 }
   0x8   :  { %80 = vmatpush.msra.mxu0 %v69_v5  ;;  %v60_v15 = vld [vmem:[%s333_s4 + $0x18] sm:$0xff]  ;;  %v59_v16 = vld [vmem:[%s333_s4 + $0x10] sm:$0xff]  ;;  %v58_v17 = vld [vmem:[%s333_s4 + $0x8] sm:$0xff] }
   0x9   :  { %v57_v18 = vld [vmem:[%s333_s4] sm:$0xff]  ;;  %v105_v19 = vld [vmem:[%s335_s6 + $0x38] sm:$0xff]  ;;  %v104_v20 = vld [vmem:[%s335_s6 + $0x30] sm:$0xff] }
   0xa   :  { %81 = vmatpush.msra.mxu0 %v68_v6  ;;  %156 = vset.pattern.permute.xlu0 %v189_v8  ;;  %v103_v21 = vld [vmem:[%s335_s6 + $0x28] sm:$0xff]  ;;  %v102_v22 = vld [vmem:[%s335_s6 + $0x20] sm:$0xff]  ;;  %v101_v23 = vld [vmem:[%s335_s6 + $0x18] sm:$0xff] }
   0xb   :  { %43 = vperm.xlu0 %156, %v30_v0   ;;  %122 = vmatpush.msra.mxu1 %v105_v19  ;;  %v157_v25 = vld [vmem:[%s330_s1] ss:$0 sm:$0xff]  ;;  %v100_v34 = vld [vmem:[%s335_s6 + $0x10] sm:$0xff]  ;;  %v99_v35 = vld [vmem:[%s335_s6 + $0x8] sm:$0xff] }
   0xc   :  { %82 = vmatpush.msra.mxu0 %v67_v7  ;;  %v158_v26 = vld [vmem:[%s331_s2] ss:$0 sm:$0xff] }
   0xd   :  { %123 = vmatpush.msra.mxu1 %v104_v20  ;;  %v159_v30 = vld [vmem:[%s332_s3] ss:$0 sm:$0xff] }
   0xe   :  { %83 = vmatpush.msra.mxu0 %v66_v9  ;;  %v98_v36 = vld [vmem:[%s335_s6] sm:$0xff]  ;;  %s142_s6 = sshll.u32 %s337_s8, 4  ;;  %s143_s6 = int_to_ptr.hbm [resolvable:$true] %s142_s6 }
   0xf   :  { %124 = vmatpush.msra.mxu1 %v103_v21  ;;  %v160_v37 = vld [vmem:[%s334_s5] ss:$0 sm:$0xff] }
  0x10   :  { %84 = vmatpush.msra.mxu0 %v65_v10  ;;  %v161_v41 = vld [vmem:[%s336_s7] ss:$0 sm:$0xff] }
  0x11   :  { %125 = vmatpush.msra.mxu1 %v102_v22 }
  0x12   :  { %85 = vmatpush.msra.mxu0 %v64_v11 }
  0x13   :  { %126 = vmatpush.msra.mxu1 %v101_v23 }
  0x14   :  { %86 = vmatpush.msra.mxu0 %v63_v12 }
  0x15   :  { %127 = vmatpush.msra.mxu1 %v100_v34 }
  0x16   :  { %87 = vmatpush.msra.mxu0 %v62_v13 }
  0x17   :  { %128 = vmatpush.msra.mxu1 %v99_v35 }
  0x18   :  { %88 = vmatpush.msra.mxu0 %v61_v14 }
  0x19   :  { %129 = vmatpush.msra.mxu1 %v98_v36 }
  0x1a   :  { %89 = vmatpush.msra.mxu0 %v60_v15 }
  0x1c   :  { %90 = vmatpush.msra.mxu0 %v59_v16 }
  0x1e   :  { %91 = vmatpush.msra.mxu0 %v58_v17 }
  0x20   :  { %92 = vmatpush.msra.mxu0 %v57_v18 }
  0x74   :  { %v35_v24 = vpop.permute.xlu0 %34 }
  0x75   :  { %v40_v28 = vmul.f32 %v157_v25, %v35_v24 }
  0x7d   :  { %v44_v27 = vpop.permute.xlu0 %43 }
  0x7e   :  { %v49_v29 = vmul.f32 %v158_v26, %v44_v27 }
  0x80   :  { %v50_v31 = vadd.f32 %v49_v29, %v40_v28 }
  0x82   :  { %v55_v32 = vadd.f32 %v159_v30, %v50_v31 }
  0x84   :  { %v56_v33 = vmax.f32 %v55_v32, 0.0 }
  0x86   :  { %93 = vmatmul.f32.vlgmr.msra.gmra.mxu0 %v56_v33 }
 0x103   :  { %v94_v38 = vpop.f32.mrf.mxu0 }
 0x104   :  { %v95_v39 = vadd.f32 %v160_v37, %v94_v38 }
 0x106   :  { %v97_v40 = vmax.f32 %v95_v39, 0.0 }
 0x108   :  { %151 = vmatmul.msk.f32.vlgmr.msra.gmra.mxu1 %vm110_vm0, %v97_v40 }
 0x185   :  { %v131_v42 = vpop.f32.mrf.mxu1 }
 0x186   :  { %v132_v43 = vadd.f32 %v161_v41, %v131_v42 }
 0x188   :  { %134 = vst [vmem:[#allocation2] sm:$0xff] %v132_v43 }
 0x189   :  { %145 = dma.vmem_to_hbm [thread:$0]  %s141_s15, 128, %s143_s6, [#allocation3]  }
 0x18a   :  { %186 = dma.done.wait [#allocation3], 128  }
 0x18b   :  { %187 = vsyncadd [#allocation3], 4294967168 }
 0x18c   :  { %150 = vsyncpa [#allocation3], 1 }

</bundles_post_ra>
